<compile_context>
chip_gen: v7x
topology: tpu7x:2x2x1
jax: 0.10.0
libtpu: 0.0.40
codegen_flags: <defaults>
</compile_context>

<pallas_src>
import math

import jax
import jax.numpy as jnp
from jax import lax
from jax.experimental import pallas as pl
from jax.experimental.pallas import tpu as pltpu

_EPS = 1e-12  # torch.nn.functional.normalize default eps


def _make_cd_loss_kernel(num_experts, num_classes, c_tile, n_pairs, needs_mask):
    inv_denom = 1.0 / (float(num_classes) * float(n_pairs))

    def kernel(w_ref, out_ref):
        # w_ref   : VMEM (E, C_TILE, D) slab of stacked expert weights
        # out_ref : VMEM (1, 1) f32, resident across the class-tile grid
        t = pl.program_id(0)

        @pl.when(t == 0)
        def _init():
            out_ref[...] = jnp.zeros_like(out_ref)

        w = w_ref[...].astype(jnp.float32)                        # (E, Ct, D)

        # Inverse row L2 norms only — never materialize normalized weights.
        # rsqrt(max(|w|^2, eps^2)) == 1 / max(||w||, eps)  (torch F.normalize).
        sq = jnp.sum(w * w, axis=-1, keepdims=True)               # (E, Ct, 1)
        inv = lax.rsqrt(jnp.maximum(sq, jnp.float32(_EPS * _EPS)))

        # Static i-outer / j-inner pair loop: w[i], inv[i] reused across all j.
        acc = jnp.zeros((c_tile, 1), jnp.float32)
        for i in range(num_experts):
            wi = w[i]                                             # (Ct, D)
            inv_i = inv[i]                                        # (Ct, 1)
            for j in range(i + 1, num_experts):
                dot = jnp.sum(wi * w[j], axis=-1, keepdims=True)  # (Ct, 1)
                acc = acc + jnp.abs(dot * inv_i * inv[j])

        if needs_mask:
            # Last class tile may be padded with undefined data; zero it out.
            cls = t * c_tile + lax.broadcasted_iota(jnp.int32, (c_tile, 1), 0)
            acc = jnp.where(cls < num_classes, acc, 0.0)

        out_ref[...] += jnp.sum(acc, axis=0, keepdims=True)       # (1, 1)

        @pl.when(t == pl.num_programs(0) - 1)
        def _finalize():
            out_ref[...] = out_ref[...] * jnp.float32(inv_denom)

    return kernel


def classifier_diversification_loss(expert_weights, class_tile=None):
    """expert_weights: list of [C, D] arrays (same shape). Returns scalar f32."""
    num_experts = len(expert_weights)
    n_pairs = num_experts * (num_experts - 1) // 2
    if n_pairs == 0:
        return jnp.float32(0.0)

    w = jnp.stack(expert_weights, axis=0)  # (E, C, D)
    E, C, D = w.shape

    if class_tile is None:
        # Size the class tile so (double-buffered input slab + f32 working set)
        # fits well under the default scoped VMEM limit on all generations.
        per_class_bytes = E * D * (2 * w.dtype.itemsize + 8)
        budget = 8 << 20
        max_ct = max(8, budget // max(per_class_bytes, 1))
        c_tile = C if C <= max_ct else (max_ct // 8) * 8
    else:
        c_tile = class_tile if class_tile < C else C

    num_tiles = pl.cdiv(C, c_tile)
    needs_mask = (C % c_tile) != 0

    kernel = _make_cd_loss_kernel(E, C, c_tile, n_pairs, needs_mask)

    grid_spec = pl.GridSpec(
        grid=(num_tiles,),
        in_specs=[pl.BlockSpec((E, c_tile, D), lambda c: (0, c, 0))],
        out_specs=pl.BlockSpec((1, 1), lambda c: (0, 0)),
    )

    out = pl.pallas_call(
        kernel,
        out_shape=jax.ShapeDtypeStruct((1, 1), jnp.float32),
        grid_spec=grid_spec,
        compiler_params=pltpu.CompilerParams(
            # Class axis is a reduction into the resident output block.
            dimension_semantics=("arbitrary",),
        ),
    )(w)

    return out[0, 0]


def _reference_loss(expert_weights):
    """Plain-JAX reference replicating the PyTorch forward."""
    num_experts = len(expert_weights)
    total = 0.0
    count = 0
    for i in range(num_experts):
        for j in range(i + 1, num_experts):
            wi = expert_weights[i]
            wj = expert_weights[j]
            ni = jnp.maximum(jnp.linalg.norm(wi, axis=1, keepdims=True), _EPS)
            nj = jnp.maximum(jnp.linalg.norm(wj, axis=1, keepdims=True), _EPS)
            cos = jnp.sum((wi / ni) * (wj / nj), axis=1)
            total = total + jnp.mean(jnp.abs(cos))
            count += 1
    return total / count if count > 0 else jnp.float32(0.0)


if __name__ == "__main__":
    key = jax.random.PRNGKey(0)

    # --- Case 1: small head, single class tile. ---
    num_experts = 3
    num_classes = 8
    feature_dim = 32
    keys = jax.random.split(key, num_experts)
    bound = 1.0 / math.sqrt(feature_dim)
    expert_weights = [
        jax.random.uniform(
            k, (num_classes, feature_dim), dtype=jnp.float32,
            minval=-bound, maxval=bound,
        )
        for k in keys
    ]
    loss = jax.block_until_ready(classifier_diversification_loss(expert_weights))
    ref = jax.block_until_ready(_reference_loss(expert_weights))
    assert jnp.allclose(loss, ref, rtol=1e-5, atol=1e-5), (loss, ref)

    # --- Case 2: exercises multi-tile grid + padded-class masking path. ---
    num_experts2 = 4
    num_classes2 = 20   # not a multiple of the forced tile of 8
    feature_dim2 = 128
    keys2 = jax.random.split(jax.random.PRNGKey(1), num_experts2)
    bound2 = 1.0 / math.sqrt(feature_dim2)
    expert_weights2 = [
        jax.random.uniform(
            k, (num_classes2, feature_dim2), dtype=jnp.float32,
            minval=-bound2, maxval=bound2,
        )
        for k in keys2
    ]
    loss2 = jax.block_until_ready(
        classifier_diversification_loss(expert_weights2, class_tile=8)
    )
    ref2 = jax.block_until_ready(_reference_loss(expert_weights2))
    assert jnp.allclose(loss2, ref2, rtol=1e-5, atol=1e-5), (loss2, ref2)

    print("KERNEL_OK")
</pallas_src>

<mosaic_0001>
module attributes {stable_mosaic.version = 11 : i64} {
  func.func @kernel(%arg0: i32, %arg1: memref<3x8x32xf32, #tpu.memory_space<vmem>>, %arg2: memref<1x1xf32, #tpu.memory_space<vmem>>) attributes {dimension_semantics = [#tpu.dimension_semantics<arbitrary>], iteration_bounds = array<i64: 1>, scalar_prefetch = 0 : i64, scratch_operands = 0 : i64, tpu.core_type = #tpu.core_type<tc>, window_params = [{transform_indices = @transform_0, window_bounds = array<i64: 3, 8, 32>}, {pipeline_mode = #tpu.pipeline_mode<synchronous>, transform_indices = @transform_1, window_bounds = array<i64: 1, 1>}]} {
    %c0_i32 = arith.constant 0 : i32
    %0 = arith.cmpi eq, %arg0, %c0_i32 : i32
    %1 = arith.extui %0 : i1 to i32
    %c0_i32_0 = arith.constant 0 : i32
    %2 = arith.cmpi ne, %1, %c0_i32_0 : i32
    scf.if %2 {
      %cst_15 = arith.constant 0.000000e+00 : f32
      %60 = vector.broadcast %cst_15 : f32 to vector<1x1xf32>
      %c0_16 = arith.constant 0 : index
      %c0_17 = arith.constant 0 : index
      %61 = vector.load %arg2[%c0_16, %c0_17] : memref<1x1xf32, #tpu.memory_space<vmem>>, vector<1x1xf32>
      tpu.vector_store %arg2[%c0_16, %c0_17], %60 {strides = array<i32>} : memref<1x1xf32, #tpu.memory_space<vmem>>, vector<1x1xf32>,
    } else {
    }
    %c0 = arith.constant 0 : index
    %c0_1 = arith.constant 0 : index
    %c0_2 = arith.constant 0 : index
    %3 = vector.load %arg1[%c0, %c0_1, %c0_2] : memref<3x8x32xf32, #tpu.memory_space<vmem>>, vector<3x8x32xf32>
    %4 = arith.mulf %3, %3 : vector<3x8x32xf32>
    %cst = arith.constant dense<0.000000e+00> : vector<3x8xf32>
    %5 = vector.multi_reduction <add>, %4, %cst [2] : vector<3x8x32xf32> to vector<3x8xf32>
    %6 = vector.shape_cast %5 : vector<3x8xf32> to vector<3x8x1xf32>
    %cst_3 = arith.constant 1.000000e-24 : f32
    %7 = vector.broadcast %cst_3 : f32 to vector<3x8x1xf32>
    %8 = arith.maximumf %6, %7 : vector<3x8x1xf32>
    %9 = math.rsqrt %8 : vector<3x8x1xf32>
    %cst_4 = arith.constant 0.000000e+00 : f32
    %10 = vector.broadcast %cst_4 : f32 to vector<8x1xf32>
    %11 = vector.extract_strided_slice %3 {offsets = [0, 0, 0], sizes = [1, 8, 32], strides = [1, 1, 1]} : vector<3x8x32xf32> to vector<1x8x32xf32>
    %12 = vector.shape_cast %11 : vector<1x8x32xf32> to vector<8x32xf32>
    %13 = vector.extract_strided_slice %9 {offsets = [0, 0, 0], sizes = [1, 8, 1], strides = [1, 1, 1]} : vector<3x8x1xf32> to vector<1x8x1xf32>
    %14 = vector.shape_cast %13 : vector<1x8x1xf32> to vector<8x1xf32>
    %15 = vector.extract_strided_slice %3 {offsets = [1, 0, 0], sizes = [1, 8, 32], strides = [1, 1, 1]} : vector<3x8x32xf32> to vector<1x8x32xf32>
    %16 = vector.shape_cast %15 : vector<1x8x32xf32> to vector<8x32xf32>
    %17 = arith.mulf %12, %16 : vector<8x32xf32>
    %cst_5 = arith.constant dense<0.000000e+00> : vector<8xf32>
    %18 = vector.multi_reduction <add>, %17, %cst_5 [1] : vector<8x32xf32> to vector<8xf32>
    %19 = vector.shape_cast %18 : vector<8xf32> to vector<8x1xf32>
    %20 = arith.mulf %19, %14 : vector<8x1xf32>
    %21 = vector.extract_strided_slice %9 {offsets = [1, 0, 0], sizes = [1, 8, 1], strides = [1, 1, 1]} : vector<3x8x1xf32> to vector<1x8x1xf32>
    %22 = vector.shape_cast %21 : vector<1x8x1xf32> to vector<8x1xf32>
    %23 = arith.mulf %20, %22 : vector<8x1xf32>
    %24 = math.absf %23 : vector<8x1xf32>
    %25 = arith.addf %10, %24 : vector<8x1xf32>
    %26 = vector.extract_strided_slice %3 {offsets = [2, 0, 0], sizes = [1, 8, 32], strides = [1, 1, 1]} : vector<3x8x32xf32> to vector<1x8x32xf32>
    %27 = vector.shape_cast %26 : vector<1x8x32xf32> to vector<8x32xf32>
    %28 = arith.mulf %12, %27 : vector<8x32xf32>
    %cst_6 = arith.constant dense<0.000000e+00> : vector<8xf32>
    %29 = vector.multi_reduction <add>, %28, %cst_6 [1] : vector<8x32xf32> to vector<8xf32>
    %30 = vector.shape_cast %29 : vector<8xf32> to vector<8x1xf32>
    %31 = arith.mulf %30, %14 : vector<8x1xf32>
    %32 = vector.extract_strided_slice %9 {offsets = [2, 0, 0], sizes = [1, 8, 1], strides = [1, 1, 1]} : vector<3x8x1xf32> to vector<1x8x1xf32>
    %33 = vector.shape_cast %32 : vector<1x8x1xf32> to vector<8x1xf32>
    %34 = arith.mulf %31, %33 : vector<8x1xf32>
    %35 = math.absf %34 : vector<8x1xf32>
    %36 = arith.addf %25, %35 : vector<8x1xf32>
    %37 = vector.extract_strided_slice %3 {offsets = [1, 0, 0], sizes = [1, 8, 32], strides = [1, 1, 1]} : vector<3x8x32xf32> to vector<1x8x32xf32>
    %38 = vector.shape_cast %37 : vector<1x8x32xf32> to vector<8x32xf32>
    %39 = vector.extract_strided_slice %9 {offsets = [1, 0, 0], sizes = [1, 8, 1], strides = [1, 1, 1]} : vector<3x8x1xf32> to vector<1x8x1xf32>
    %40 = vector.shape_cast %39 : vector<1x8x1xf32> to vector<8x1xf32>
    %41 = vector.extract_strided_slice %3 {offsets = [2, 0, 0], sizes = [1, 8, 32], strides = [1, 1, 1]} : vector<3x8x32xf32> to vector<1x8x32xf32>
    %42 = vector.shape_cast %41 : vector<1x8x32xf32> to vector<8x32xf32>
    %43 = arith.mulf %38, %42 : vector<8x32xf32>
    %cst_7 = arith.constant dense<0.000000e+00> : vector<8xf32>
    %44 = vector.multi_reduction <add>, %43, %cst_7 [1] : vector<8x32xf32> to vector<8xf32>
    %45 = vector.shape_cast %44 : vector<8xf32> to vector<8x1xf32>
    %46 = arith.mulf %45, %40 : vector<8x1xf32>
    %47 = vector.extract_strided_slice %9 {offsets = [2, 0, 0], sizes = [1, 8, 1], strides = [1, 1, 1]} : vector<3x8x1xf32> to vector<1x8x1xf32>
    %48 = vector.shape_cast %47 : vector<1x8x1xf32> to vector<8x1xf32>
    %49 = arith.mulf %46, %48 : vector<8x1xf32>
    %50 = math.absf %49 : vector<8x1xf32>
    %51 = arith.addf %36, %50 : vector<8x1xf32>
    %c0_8 = arith.constant 0 : index
    %c0_9 = arith.constant 0 : index
    %52 = vector.load %arg2[%c0_8, %c0_9] : memref<1x1xf32, #tpu.memory_space<vmem>>, vector<1x1xf32>
    %cst_10 = arith.constant dense<0.000000e+00> : vector<1xf32>
    %53 = vector.multi_reduction <add>, %51, %cst_10 [0] : vector<8x1xf32> to vector<1xf32>
    %54 = vector.shape_cast %53 : vector<1xf32> to vector<1x1xf32>
    %55 = arith.addf %52, %54 : vector<1x1xf32>
    %c0_11 = arith.constant 0 : index
    %c0_12 = arith.constant 0 : index
    %56 = vector.load %arg2[%c0_11, %c0_12] : memref<1x1xf32, #tpu.memory_space<vmem>>, vector<1x1xf32>
    tpu.vector_store %arg2[%c0_11, %c0_12], %55 {strides = array<i32>} : memref<1x1xf32, #tpu.memory_space<vmem>>, vector<1x1xf32>,
    %c0_i32_13 = arith.constant 0 : i32
    %57 = arith.cmpi eq, %arg0, %c0_i32_13 : i32
    %58 = arith.extui %57 : i1 to i32
    %c0_i32_14 = arith.constant 0 : i32
    %59 = arith.cmpi ne, %58, %c0_i32_14 : i32
    scf.if %59 {
      %c0_15 = arith.constant 0 : index
      %c0_16 = arith.constant 0 : index
      %60 = vector.load %arg2[%c0_15, %c0_16] : memref<1x1xf32, #tpu.memory_space<vmem>>, vector<1x1xf32>
      %cst_17 = arith.constant 0.0416666679 : f32
      %61 = vector.broadcast %cst_17 : f32 to vector<1x1xf32>
      %62 = arith.mulf %60, %61 : vector<1x1xf32>
      %c0_18 = arith.constant 0 : index
      %c0_19 = arith.constant 0 : index
      %63 = vector.load %arg2[%c0_18, %c0_19] : memref<1x1xf32, #tpu.memory_space<vmem>>, vector<1x1xf32>
      tpu.vector_store %arg2[%c0_18, %c0_19], %62 {strides = array<i32>} : memref<1x1xf32, #tpu.memory_space<vmem>>, vector<1x1xf32>,
    } else {
    }
    return
  }
  func.func @transform_0(%arg0: i32) -> (i32, i32, i32) {
    %c0_i32 = arith.constant 0 : i32
    %c0_i32_0 = arith.constant 0 : i32
    %c0_i32_1 = arith.constant 0 : i32
    return %c0_i32, %arg0, %c0_i32_0 : i32, i32, i32
  }
  func.func @transform_1(%arg0: i32) -> (i32, i32) {
    %c0_i32 = arith.constant 0 : i32
    %c0_i32_0 = arith.constant 0 : i32
    %c0_i32_1 = arith.constant 0 : i32
    return %c0_i32, %c0_i32_0 : i32, i32
  }
}

</mosaic_0001>

<bundles_post_ra>
// kernel: tpu_custom_call.1
= control target key start
LH: loop header
LB: loop body
LE: loop exit
PB: predicated region body
PF: predicated region fallthrough
CT: control target
= control target key end

     0   :  { %6 = vsyncpa [#allocation3], 0  ;;  %s213_s0 = inlined_call_operand.hbm [shape: f32[3,8,32], index: 0, kind: input, shape index: {}]   ;;  %s214_s1 = inlined_call_operand.hbm [shape: f32[1,1], index: 1, kind: output, shape index: {}]  }
   0x1   :  { %7 = vsyncpa [#allocation4], 0  ;;  %s165_s6 = smov [#allocation2]   ;;  %s117_s10 = scalar_lea.hbm %s213_s0, 384 }
   0x2   :  { %s13_s7 = sshll.u32 %s165_s6, 4  ;;  %p118_p0 = scmp.ne.s32.totalorder %s213_s0, %s117_s10  ;;  %s14_s7 = int_to_ptr.vmem [resolvable:$true] %s13_s7 }
   0x3   :  { %p121_p1 = scmp.lt.u32.totalorder %s117_s10, %s213_s0 }
   0x5   :  { %p123_p2 = pnand %p121_p1, %p118_p0 }
   0x7   :  { %126 = shalt.err (!%p123_p2)
}
   0x8   :  { %s127_s15 = scalar_lea.vmem %s14_s7, 384  ;;  %p132_p4 = scmp.lt.s32.totalorder %s14_s7, %s14_s7 }
   0x9   :  { %p128_p3 = scmp.ne.s32.totalorder %s14_s7, %s127_s15  ;;  %p133_p5 = scmp.lt.s32.totalorder %s127_s15, %s127_s15 }
   0xb   :  { %p134_p6 = por %p133_p5, %p132_p4 }
   0xd   :  { %p135_p7 = pnand %p134_p6, %p128_p3 }
   0xf   :  { %138 = shalt.err (!%p135_p7)
}
  0x10   :  { %s166_s16 = smov 128   ;;  %s167_s17 = smov 8  }
  0x11   :  { %19 = dma.hbm_to_vmem [thread:$0]  %s213_s0, 384, %s14_s7, [#allocation3], %s166_s16, %s166_s16, %s167_s17  }
  0x12   :  { %161 = dma.done.wait [#allocation3], 384  }
  0x13   :  { %162 = vsyncadd [#allocation3], 4294966912  ;;  %v29_v0 = vld [vmem:[#allocation2] sm:$0xff]  ;;  %vm35_vm0 = vcmask 261120   ;;  %v31_v1 = vld [vmem:[#allocation2 + $0x10] sm:$0xff]  ;;  %vm27_vm1 = vcmask 0  }
  0x14   :  { %v30_v2 = vld [vmem:[#allocation2 + $0x8] sm:$0xff]  ;;  %v32_v3 = vmul.f32 %v29_v0, %v29_v0  ;;  %v34_v4 = vmul.f32 %v31_v1, %v31_v1  ;;  %v59_v11 = vmul.f32 %v31_v1, %v29_v0  ;;  %v168_v15 = vmov 0.0   ;;  %s169_s0 = smov [#allocation5]  }
  0x15   :  { %v33_v5 = vmul.f32 %v30_v2, %v30_v2  ;;  %v51_v6 = vmul.f32 %v30_v2, %v29_v0  ;;  %v67_v12 = vmul.f32 %v31_v1, %v30_v2  ;;  %28 = vst.msk [vmem:[#allocation5] sm:$0x1] %vm27_vm1, %v168_v15  ;;  %s97_s20 = sshll.u32 %s169_s0, 4  ;;  %s98_s20 = int_to_ptr.vmem [resolvable:$true] %s97_s20 }
  0x16   :  { %v36_v7 = vsel %vm35_vm0, %v32_v3, 0.0  ;;  %v42_v8 = vsel %vm35_vm0, %v34_v4, 0.0  ;;  %v60_v13 = vsel %vm35_vm0, %v59_v11, 0.0  ;;  %s139_s21 = scalar_lea.vmem %s98_s20, 16  ;;  %s143_s22 = scalar_lea.vmem %s98_s20, 32 }
  0x17   :  { %37 = vadd.xlane.f32.xlu0 %v36_v7  ;;  %43 = vadd.xlane.f32.xlu1 %v42_v8  ;;  %v39_v9 = vsel %vm35_vm0, %v33_v5, 0.0  ;;  %v52_v10 = vsel %vm35_vm0, %v51_v6, 0.0  ;;  %v68_v14 = vsel %vm35_vm0, %v67_v12, 0.0  ;;  %p140_p8 = scmp.ne.s32.totalorder %s98_s20, %s139_s21  ;;  %p144_p9 = scmp.lt.s32.totalorder %s98_s20, %s98_s20 }
  0x18   :  { %p145_p10 = scmp.lt.s32.totalorder %s143_s22, %s139_s21 }
  0x1a   :  { %p146_p11 = por %p145_p10, %p144_p9 }
  0x1b   :  { %40 = vadd.xlane.f32.xlu0 %v39_v9  ;;  %53 = vadd.xlane.f32.xlu1 %v52_v10 }
  0x1c   :  { %v75_v44 = vld [vmem:[#allocation5] sm:$0x1]  ;;  %p147_p12 = pnand %p146_p11, %p140_p8 }
  0x1f   :  { %61 = vadd.xlane.f32.xlu0 %v60_v13  ;;  %69 = vadd.xlane.f32.xlu1 %v68_v14 }
  0xa4   :  { %v38_v16 = vpop.xlane.xlu0 %37  ;;  %v44_v17 = vpop.xlane.xlu1 %43 }
  0xa5   :  { %v45_v18 = vmax.f32 %v38_v16, 1e-24  ;;  %v47_v19 = vmax.f32 %v44_v17, 1e-24 }
  0xa7   :  { %111 = vrsqrt.f32 %v45_v18 }
  0xa8   :  { %113 = vrsqrt.f32 %v47_v19  ;;  %v41_v20 = vpop.xlane.xlu0 %40  ;;  %v54_v22 = vpop.xlane.xlu1 %53 }
  0xa9   :  { %v46_v21 = vmax.f32 %v41_v20, 1e-24 }
  0xab   :  { %115 = vrsqrt.f32 %v46_v21 }
  0xac   :  { %v62_v23 = vpop.xlane.xlu0 %61  ;;  %v70_v27 = vpop.xlane.xlu1 %69 }
  0xb1   :  { %v112_v24 = vpop.eup %111 }
  0xb2   :  { %v114_v25 = vpop.eup %113  ;;  %v63_v26 = vmul.f32 %v112_v24, %v62_v23  ;;  %v55_v28 = vmul.f32 %v112_v24, %v54_v22 }
  0xb4   :  { %v64_v29 = vmul.f32 %v114_v25, %v63_v26 }
  0xb5   :  { %v116_v30 = vpop.eup %115 }
  0xb6   :  { %v56_v31 = vmul.f32 %v116_v30, %v55_v28  ;;  %v71_v32 = vmul.f32 %v116_v30, %v70_v27  ;;  %v65_v34 = vand.u32 2147483647, %v64_v29 }
  0xb8   :  { %v57_v33 = vand.u32 2147483647, %v56_v31  ;;  %v72_v35 = vmul.f32 %v114_v25, %v71_v32 }
  0xba   :  { %v66_v36 = vadd.f32 %v65_v34, %v57_v33  ;;  %v73_v37 = vand.u32 2147483647, %v72_v35 }
  0xbc   :  { %v74_v38 = vadd.f32 %v73_v37, %v66_v36 }
  0xbe   :  { %v76_v39 = vrot.slane %v74_v38, 4 }
  0xc0   :  { %v77_v40 = vadd.f32 %v76_v39, %v74_v38 }
  0xc2   :  { %v78_v41 = vrot.slane %v77_v40, 2 }
  0xc4   :  { %v79_v42 = vadd.f32 %v78_v41, %v77_v40 }
  0xc6   :  { %v80_v43 = vrot.slane %v79_v42, 1 }
  0xc8   :  { %v81_v45 = vadd.f32 %v80_v43, %v79_v42 }
  0xca   :  { %v82_v46 = vadd.f32 %v81_v45, %v75_v44 }
  0xcc   :  { %84 = vst.msk [vmem:[#allocation5] sm:$0x1] %vm27_vm1, %v82_v46 }
  0xd3   :  { %v88_v47 = vld [vmem:[#allocation5] sm:$0x1] }
  0xd4   :  { %v89_v48 = vmul.f32 0.041666668, %v88_v47 }
  0xd6   :  { %90 = vst.msk [vmem:[#allocation5] sm:$0x1] %vm27_vm1, %v89_v48 }
  0xd7   :  { %150 = shalt.err (!%p147_p12)
}
  0xd8   :  { %s151_s25 = scalar_lea.hbm %s214_s1, 16 }
  0xd9   :  { %p152_p13 = scmp.ne.s32.totalorder %s214_s1, %s151_s25  ;;  %p155_p0 = scmp.lt.u32.totalorder %s151_s25, %s214_s1 }
  0xdb   :  { %p157_p1 = pnand %p155_p0, %p152_p13 }
  0xdd   :  { %160 = shalt.err (!%p157_p1)
}
  0xde   :  { %100 = dma.vmem_to_hbm [thread:$0]  %s98_s20, 16, %s214_s1, [#allocation4]  }
  0xdf   :  { %163 = dma.done.wait [#allocation4], 16  }
  0xe0   :  { %164 = vsyncadd [#allocation4], 4294967280 }
  0xe1   :  { %104 = vsyncpa [#allocation3], 1 }
  0xe2   :  { %105 = vsyncpa [#allocation4], 1 }

</bundles_post_ra>
